<compile_context>
chip_gen: v5e
topology: v5e:2x2
jax: 0.10.0
libtpu: 0.0.40
codegen_flags: <defaults>
</compile_context>

<pallas_src>
import jax
import jax.numpy as jnp
from jax.experimental import pallas as pl
from jax.experimental.pallas import tpu as pltpu


def _affinity_kernel(s_ref, mask_ref, w1_ref, b1_ref, w2_ref, b2_ref, out_ref):
    bt, n = mask_ref.shape           # b_tile, N
    c = s_ref.shape[1]               # C

    # ---- linear1 + relu: one MXU pass over the flattened (b_tile*N, C) slab ----
    # s and w1 are in the activation dtype (bf16 runs the MXU at full rate); f32 accumulate.
    h = jnp.dot(s_ref[...], w1_ref[...], preferred_element_type=jnp.float32)
    h = jnp.maximum(h + b1_ref[...], 0.0)                       # [bt*N, C] f32

    # ---- masked per-batch mean: VPU multiply + sublane reduce (no MXU, no O(bt^2) mask) ----
    mask = mask_ref[...].astype(jnp.float32)                    # [bt, N]
    h3 = h.reshape(bt, n, c)                                    # leading-dim split; lanes untouched
    msum = jnp.sum(h3 * mask[:, :, None], axis=1)               # [bt, C]
    denom = jnp.sum(mask, axis=1, keepdims=True)                # [bt, 1]
    # Matches the reference exactly: an all-zero mask row yields inf/nan, same as PyTorch.
    mean = msum / denom                                         # [bt, C] f32

    # ---- output projection: single batched matmul, one dense [bt, num_bins] store ----
    out = jnp.dot(mean.astype(w2_ref.dtype), w2_ref[...],
                  preferred_element_type=jnp.float32) + b2_ref[...]
    out_ref[...] = out.astype(out_ref.dtype)


def _vmem_estimate(bt, N, C, num_bins, itemsize):
    """Approximate live VMEM for one grid step (default double-buffering on I/O)."""
    s_tile = bt * N * C * itemsize * 2          # input activations, double-buffered
    mask = bt * N * 4 * 2                       # f32 mask tile, double-buffered
    h = bt * N * C * 4 * 2                      # f32 intermediate (h and masked product)
    weights = (C * C + C * num_bins) * itemsize * 2 + (C + num_bins) * 4 * 2
    out = bt * num_bins * 4 * 2
    return s_tile + mask + h + weights + out


def _pick_b_tile(B, N, C, num_bins, itemsize,
                 vmem_budget=14 << 20,        # under v5e's 16 MiB scoped default, v7x-safe
                 prefer_two_blocks=True):
    """Choose how many batch elements to fold into one grid step.

    Candidates keep the sublane dims legal: b_tile == B, or a multiple of 8 dividing B.
    """
    cands = {B}
    cands.update(d for d in range(8, B, 8) if B % d == 0)
    cands = sorted(cands)

    legal = [bt for bt in cands
             if _vmem_estimate(bt, N, C, num_bins, itemsize) <= vmem_budget]
    if not legal:
        # TODO(synk): add an N-reduction grid axis + per-batch accumulator for very large N*C.
        return cands[0]

    best = max(legal)
    if prefer_two_blocks and best == B:
        # Give the "parallel" grid axis >= 2 blocks so both v7x TensorCores get work.
        # Per-step overhead (~0.35 us) makes this essentially free on v5e/v6e too.
        smaller = [bt for bt in legal if bt < B]
        if smaller:
            best = max(smaller)
    return best


def affinity_1d_predictor(s, ligand_mask, w1, b1, w2, b2, *, b_tile=None):
    """s: [B, N, C], ligand_mask: [B, N]; w1: [C, C], b1: [C], w2: [num_bins, C], b2: [num_bins]."""
    B, N, C = s.shape
    num_bins = w2.shape[0]
    act_dtype = s.dtype

    if b_tile is None:
        b_tile = _pick_b_tile(B, N, C, num_bins, jnp.dtype(act_dtype).itemsize)
    assert B % b_tile == 0, "b_tile must divide B"
    n_blocks = B // b_tile

    # Cheap XLA glue (reshape / transpose / cast); hoist when calling repeatedly.
    s_flat = s.reshape(B * N, C)                               # C on lanes
    mask2 = ligand_mask.astype(jnp.float32)                    # [B, N]
    w1_t = jnp.transpose(w1).astype(act_dtype)                 # [C, C]       (in, out)
    w2_t = jnp.transpose(w2).astype(act_dtype)                 # [C, num_bins]
    b1_2d = b1.astype(jnp.float32).reshape(1, C)
    b2_2d = b2.astype(jnp.float32).reshape(1, num_bins)

    grid_spec = pltpu.PrefetchScalarGridSpec(
        num_scalar_prefetch=0,
        grid=(n_blocks,),
        in_specs=[
            pl.BlockSpec((b_tile * N, C), lambda i: (i, 0)),    # s, flattened rows
            pl.BlockSpec((b_tile, N), lambda i: (i, 0)),        # ligand mask
            pl.BlockSpec((C, C), lambda i: (0, 0)),             # W1^T (grid-invariant)
            pl.BlockSpec((1, C), lambda i: (0, 0)),             # b1
            pl.BlockSpec((C, num_bins), lambda i: (0, 0)),      # W2^T (grid-invariant)
            pl.BlockSpec((1, num_bins), lambda i: (0, 0)),      # b2
        ],
        out_specs=pl.BlockSpec((b_tile, num_bins), lambda i: (i, 0)),
    )

    return pl.pallas_call(
        _affinity_kernel,
        # out dtype follows the module (activation dtype); switch to f32 if f32 logits are wanted.
        out_shape=jax.ShapeDtypeStruct((B, num_bins), act_dtype),
        grid_spec=grid_spec,
        compiler_params=pltpu.CompilerParams(
            # batch-block axis is independent -> shards across v7x's two TensorCores
            dimension_semantics=("parallel",),
            vmem_limit_bytes=32 * 1024 * 1024,
        ),
    )(s_flat, mask2, w1_t, b1_2d, w2_t, b2_2d)


def _reference(s, ligand_mask, w1, b1, w2, b2):
    h = jax.nn.relu(jnp.einsum("bnc,dc->bnd", s, w1) + b1)
    mean = (h * ligand_mask[..., None]).sum(axis=1) / ligand_mask.sum(axis=1)[..., None]
    return jnp.einsum("bc,dc->bd", mean, w2) + b2


if __name__ == "__main__":
    B, N, c_s, num_bins = 2, 8, 32, 16

    key = jax.random.PRNGKey(0)
    k_s, k_m, k_w1, k_b1, k_w2, k_b2 = jax.random.split(key, 6)

    s = jax.random.normal(k_s, (B, N, c_s), dtype=jnp.float32)
    # binary ligand mask; ensure at least one nonzero per batch element
    ligand_mask = (jax.random.uniform(k_m, (B, N)) > 0.5).astype(jnp.float32)
    ligand_mask = ligand_mask.at[:, 0].set(1.0)

    w1 = 0.1 * jax.random.normal(k_w1, (c_s, c_s), dtype=jnp.float32)       # Linear(c_s, c_s)
    b1 = 0.1 * jax.random.normal(k_b1, (c_s,), dtype=jnp.float32)
    w2 = 0.1 * jax.random.normal(k_w2, (num_bins, c_s), dtype=jnp.float32)  # Linear(c_s, num_bins)
    b2 = 0.1 * jax.random.normal(k_b2, (num_bins,), dtype=jnp.float32)

    out = affinity_1d_predictor(s, ligand_mask, w1, b1, w2, b2)
    jax.block_until_ready(out)

    ref = _reference(s, ligand_mask, w1, b1, w2, b2)
    assert out.shape == (B, num_bins)
    assert jnp.allclose(out, ref, atol=1e-5, rtol=1e-5)

    print("KERNEL_OK")
</pallas_src>

<mosaic_0001>
module attributes {stable_mosaic.version = 11 : i64} {
  func.func @_affinity_kernel(%arg0: i32, %arg1: memref<16x32xf32, #tpu.memory_space<vmem>>, %arg2: memref<2x8xf32, #tpu.memory_space<vmem>>, %arg3: memref<32x32xf32, #tpu.memory_space<vmem>>, %arg4: memref<1x32xf32, #tpu.memory_space<vmem>>, %arg5: memref<32x16xf32, #tpu.memory_space<vmem>>, %arg6: memref<1x16xf32, #tpu.memory_space<vmem>>, %arg7: memref<2x16xf32, #tpu.memory_space<vmem>>) attributes {dimension_semantics = [#tpu.dimension_semantics<parallel>], iteration_bounds = array<i64: 1>, scalar_prefetch = 0 : i64, scratch_operands = 0 : i64, tpu.core_type = #tpu.core_type<tc>, window_params = [{transform_indices = @transform_0, window_bounds = array<i64: 16, 32>}, {transform_indices = @transform_1, window_bounds = array<i64: 2, 8>}, {pipeline_mode = #tpu.pipeline_mode<synchronous>, transform_indices = @transform_2, window_bounds = array<i64: 32, 32>}, {pipeline_mode = #tpu.pipeline_mode<synchronous>, transform_indices = @transform_3, window_bounds = array<i64: 1, 32>}, {pipeline_mode = #tpu.pipeline_mode<synchronous>, transform_indices = @transform_4, window_bounds = array<i64: 32, 16>}, {pipeline_mode = #tpu.pipeline_mode<synchronous>, transform_indices = @transform_5, window_bounds = array<i64: 1, 16>}, {transform_indices = @transform_6, window_bounds = array<i64: 2, 16>}]} {
    %c0 = arith.constant 0 : index
    %c0_0 = arith.constant 0 : index
    %0 = vector.load %arg1[%c0, %c0_0] : memref<16x32xf32, #tpu.memory_space<vmem>>, vector<16x32xf32>
    %c0_1 = arith.constant 0 : index
    %c0_2 = arith.constant 0 : index
    %1 = vector.load %arg3[%c0_1, %c0_2] : memref<32x32xf32, #tpu.memory_space<vmem>>, vector<32x32xf32>
    %cst = arith.constant dense<0.000000e+00> : vector<16x32xf32>
    %2 = tpu.matmul %0, %1, %cst {dimension_numbers = #tpu.dot_dimension_numbers<[1], [0], [0], [1], [0, 0, 1, 1], [], []>} : vector<16x32xf32>, vector<32x32xf32>, vector<16x32xf32> -> vector<16x32xf32>
    %c0_3 = arith.constant 0 : index
    %c0_4 = arith.constant 0 : index
    %3 = vector.load %arg4[%c0_3, %c0_4] : memref<1x32xf32, #tpu.memory_space<vmem>>, vector<1x32xf32>
    %4 = vector.broadcast %3 : vector<1x32xf32> to vector<16x32xf32>
    %5 = arith.addf %2, %4 : vector<16x32xf32>
    %cst_5 = arith.constant 0.000000e+00 : f32
    %6 = vector.broadcast %cst_5 : f32 to vector<16x32xf32>
    %7 = arith.maximumf %5, %6 : vector<16x32xf32>
    %c0_6 = arith.constant 0 : index
    %c0_7 = arith.constant 0 : index
    %8 = vector.load %arg2[%c0_6, %c0_7] : memref<2x8xf32, #tpu.memory_space<vmem>>, vector<2x8xf32>
    %9 = vector.shape_cast %7 : vector<16x32xf32> to vector<2x8x32xf32>
    %10 = vector.shape_cast %8 : vector<2x8xf32> to vector<2x8x1xf32>
    %11 = vector.broadcast %10 : vector<2x8x1xf32> to vector<2x8x32xf32>
    %12 = arith.mulf %9, %11 : vector<2x8x32xf32>
    %cst_8 = arith.constant dense<0.000000e+00> : vector<2x32xf32>
    %13 = vector.multi_reduction <add>, %12, %cst_8 [1] : vector<2x8x32xf32> to vector<2x32xf32>
    %cst_9 = arith.constant dense<0.000000e+00> : vector<2xf32>
    %14 = vector.multi_reduction <add>, %8, %cst_9 [1] : vector<2x8xf32> to vector<2xf32>
    %15 = vector.shape_cast %14 : vector<2xf32> to vector<2x1xf32>
    %16 = vector.broadcast %15 : vector<2x1xf32> to vector<2x32xf32>
    %17 = arith.divf %13, %16 : vector<2x32xf32>
    %c0_10 = arith.constant 0 : index
    %c0_11 = arith.constant 0 : index
    %18 = vector.load %arg5[%c0_10, %c0_11] : memref<32x16xf32, #tpu.memory_space<vmem>>, vector<32x16xf32>
    %cst_12 = arith.constant dense<0.000000e+00> : vector<2x16xf32>
    %19 = tpu.matmul %17, %18, %cst_12 {dimension_numbers = #tpu.dot_dimension_numbers<[1], [0], [0], [1], [0, 0, 1, 1], [], []>} : vector<2x32xf32>, vector<32x16xf32>, vector<2x16xf32> -> vector<2x16xf32>
    %c0_13 = arith.constant 0 : index
    %c0_14 = arith.constant 0 : index
    %20 = vector.load %arg6[%c0_13, %c0_14] : memref<1x16xf32, #tpu.memory_space<vmem>>, vector<1x16xf32>
    %21 = vector.broadcast %20 : vector<1x16xf32> to vector<2x16xf32>
    %22 = arith.addf %19, %21 : vector<2x16xf32>
    %c0_15 = arith.constant 0 : index
    %c0_16 = arith.constant 0 : index
    %23 = vector.load %arg7[%c0_15, %c0_16] : memref<2x16xf32, #tpu.memory_space<vmem>>, vector<2x16xf32>
    tpu.vector_store %arg7[%c0_15, %c0_16], %22 {strides = array<i32>} : memref<2x16xf32, #tpu.memory_space<vmem>>, vector<2x16xf32>,
    return
  }
  func.func @transform_0(%arg0: i32) -> (i32, i32) {
    %c0_i32 = arith.constant 0 : i32
    %c0_i32_0 = arith.constant 0 : i32
    return %arg0, %c0_i32 : i32, i32
  }
  func.func @transform_1(%arg0: i32) -> (i32, i32) {
    %c0_i32 = arith.constant 0 : i32
    %c0_i32_0 = arith.constant 0 : i32
    return %arg0, %c0_i32 : i32, i32
  }
  func.func @transform_2(%arg0: i32) -> (i32, i32) {
    %c0_i32 = arith.constant 0 : i32
    %c0_i32_0 = arith.constant 0 : i32
    %c0_i32_1 = arith.constant 0 : i32
    return %c0_i32, %c0_i32_0 : i32, i32
  }
  func.func @transform_3(%arg0: i32) -> (i32, i32) {
    %c0_i32 = arith.constant 0 : i32
    %c0_i32_0 = arith.constant 0 : i32
    %c0_i32_1 = arith.constant 0 : i32
    return %c0_i32, %c0_i32_0 : i32, i32
  }
  func.func @transform_4(%arg0: i32) -> (i32, i32) {
    %c0_i32 = arith.constant 0 : i32
    %c0_i32_0 = arith.constant 0 : i32
    %c0_i32_1 = arith.constant 0 : i32
    return %c0_i32, %c0_i32_0 : i32, i32
  }
  func.func @transform_5(%arg0: i32) -> (i32, i32) {
    %c0_i32 = arith.constant 0 : i32
    %c0_i32_0 = arith.constant 0 : i32
    %c0_i32_1 = arith.constant 0 : i32
    return %c0_i32, %c0_i32_0 : i32, i32
  }
  func.func @transform_6(%arg0: i32) -> (i32, i32) {
    %c0_i32 = arith.constant 0 : i32
    %c0_i32_0 = arith.constant 0 : i32
    return %arg0, %c0_i32 : i32, i32
  }
}

</mosaic_0001>

<bundles_post_ra>
// kernel: tpu_custom_call.1
= control target key start
LH: loop header
LB: loop body
LE: loop exit
PB: predicated region body
PF: predicated region fallthrough
CT: control target
= control target key end

     0   :  { %11 = vsyncpa [#allocation3], 0  ;;  %s364_s0 = inlined_call_operand.vmem [shape: f32[16,32], index: 0, kind: input, shape index: {}]   ;;  %s365_s1 = inlined_call_operand.hbm [shape: f32[2,8], index: 1, kind: input, shape index: {}]   ;;  %s366_s2 = inlined_call_operand.vmem [shape: f32[32,32], index: 2, kind: input, shape index: {}]   ;;  %s367_s3 = inlined_call_operand.vmem [shape: f32[1,32], index: 3, kind: input, shape index: {}]   ;;  %s368_s4 = inlined_call_operand.vmem [shape: f32[32,16], index: 4, kind: input, shape index: {}]   ;;  %s369_s5 = inlined_call_operand.vmem [shape: f32[1,16], index: 5, kind: input, shape index: {}]   ;;  %s370_s6 = inlined_call_operand.hbm [shape: f32[2,16], index: 6, kind: output, shape index: {}]  }
   0x1   :  { %12 = vsyncpa [#allocation4], 0  ;;  %s20_s23 = sshll.u32 %s365_s1, 4  ;;  %s272_s24 = smov [#allocation2]   ;;  %s21_s23 = int_to_ptr.hbm [resolvable:$true] %s20_s23 }
   0x2   :  { %s22_s25 = sshll.u32 %s272_s24, 4  ;;  %s23_s25 = int_to_ptr.vmem [resolvable:$true] %s22_s25 }
   0x3   :  { %25 = dma.hbm_to_vmem [thread:$0]  %s21_s23, 32, %s23_s25, [#allocation3]  }
   0x4   :  { %268 = dma.done.wait [#allocation3], 32  }
   0x5   :  { %269 = vsyncadd [#allocation3], 4294967264  ;;  %v82_v0 = vlaneseq  ;;  %vm111_vm0 = vcmask 58368   ;;  %v43_v2 = vld [vmem:[%s366_s2 + $0x18] sm:$0xff]  ;;  %v80_v3 = vld [vmem:[#allocation2] sm:$0x3] }
   0x6   :  { %v42_v4 = vld [vmem:[%s366_s2 + $0x10] sm:$0xff]  ;;  %67 = vmatpush.msra.mxu0 %v43_v2  ;;  %206 = vmatpush.msra.mxu2 %v43_v2  ;;  %v112_v5 = vsel %vm111_vm0, %v80_v3, 0.0  ;;  %v41_v6 = vld [vmem:[%s366_s2 + $0x8] sm:$0xff]  ;;  %v81_v7 = vperm.slane %v80_v3, 0  ;;  %v40_v8 = vld [vmem:[%s366_s2] sm:$0xff]  ;;  %vm48_vm1 = vcmask 261120  }
   0x7   :  { %v83_v1 = vshrl.u32 %v82_v0, 7  ;;  %113 = vadd.xlane.f32.xlu0 %v112_v5  ;;  %v38_v9 = vld [vmem:[%s364_s0] sm:$0xff]  ;;  %v39_v10 = vld [vmem:[%s364_s0 + $0x8] sm:$0xff]  ;;  %v88_v11 = vperm.slane %v80_v3, 1  ;;  %v152_v13 = vld [vmem:[%s368_s4 + $0x18] sm:$0xff]  ;;  %vm160_vm10 = vcmask 1041409  }
   0x8   :  { %68 = vmatpush.msra.mxu0 %v42_v4  ;;  %207 = vmatpush.msra.mxu2 %v42_v4  ;;  %v151_v14 = vld [vmem:[%s368_s4 + $0x10] sm:$0xff]  ;;  %v150_v16 = vld [vmem:[%s368_s4 + $0x8] sm:$0xff]  ;;  %v149_v17 = vld [vmem:[%s368_s4] sm:$0xff]  ;;  %s273_s21 = smov [#allocation5]   ;;  %s193_s25 = sshll.u32 %s370_s6, 4  ;;  %vm184_vm11 = vcmask 123904   ;;  %s194_s25 = int_to_ptr.hbm [resolvable:$true] %s193_s25 }
   0x9   :  { %213 = vset.pattern.permute.xlu1 %v83_v1  ;;  %212 = vset.pattern.permute.xlu0 %v83_v1  ;;  %v214_v18 = vld [vmem:[%s367_s3] ss:$0 sm:$0xff]  ;;  %s191_s22 = sshll.u32 %s273_s21, 4  ;;  %s192_s22 = int_to_ptr.vmem [resolvable:$true] %s191_s22 }
   0xa   :  { %69 = vmatpush.msra.mxu0 %v41_v6  ;;  %208 = vmatpush.msra.mxu2 %v41_v6  ;;  %v215_v3 = vld [vmem:[%s369_s5] ss:$0 sm:$0xff] }
   0xb   :  { %176 = vmatpush.msra.mxu1 %v152_v13 }
   0xc   :  { %70 = vmatpush.msra.mxu0 %v40_v8  ;;  %209 = vmatpush.msra.mxu2 %v40_v8 }
   0xd   :  { %203 = vmatmul.msk.f32.vlgmr.msra.gmra.mxu0 %vm48_vm1, %v38_v9  ;;  %204 = vmatmul.msk.f32.vlgmr.msra.gmra.mxu2 %vm48_vm1, %v39_v10 }
   0xe   :  { %177 = vmatpush.msra.mxu1 %v151_v14 }
  0x10   :  { %178 = vmatpush.msra.mxu1 %v150_v16 }
  0x11   :  { %86 = vperm.xlu1 %213, %v81_v7  }
  0x12   :  { %179 = vmatpush.msra.mxu1 %v149_v17 }
  0x1b   :  { %93 = vperm.xlu0 %212, %v88_v11  }
  0x7a   :  { %v332_v12 = vpop.xlane.xlu0 %113 }
  0x7b   :  { %v116_v15 = vrot.slane %v332_v12, 1  ;;  %vm124_vm4 = vweird.f32 %v332_v12  ;;  %v130_v52 = vand.u32 2147483648, %v332_v12  ;;  %v128_v54 = vand.u32 2147483647, %v332_v12 }
  0x7d   :  { %216 = vrcp.f32 %v116_v15  ;;  %vm139_vm2 = vweird.f32 %v116_v15  ;;  %v143_v47 = vand.u32 2147483647, %v116_v15  ;;  %v145_v48 = vand.u32 2147483648, %v116_v15 }
  0x7e   :  { %218 = vrcp.f32 %v332_v12  ;;  %v131_v60 = vor.u32 1.1754944e-38, %v130_v52  ;;  %vm129_vm9 = vcmp.eq.f32.partialorder %v128_v54, 8.507059e+37 }
  0x7f   :  { %v146_v56 = vor.u32 1.1754944e-38, %v145_v48  ;;  %vm144_vm8 = vcmp.eq.f32.partialorder %v143_v47, 8.507059e+37 }
  0x83   :  { %v87_v21 = vpop.permute.xlu1 %86  ;;  %v217_v22 = vpop.eup %216 }
  0x84   :  { %v219_v24 = vpop.eup %218  ;;  %v135_v27 = vmul.f32 %v217_v22, %v116_v15  ;;  %vm140_vm3 = vweird.f32 %v217_v22 }
  0x85   :  { %v120_v30 = vmul.f32 %v219_v24, %v332_v12  ;;  %vm125_vm5 = vweird.f32 %v219_v24  ;;  %vm141_vm6 = vmor %vm139_vm2, %vm140_vm3 }
  0x86   :  { %v136_v35 = vsub.f32 1.0, %v135_v27  ;;  %vm126_vm7 = vmor %vm124_vm4, %vm125_vm5 }
  0x87   :  { %v121_v37 = vsub.f32 1.0, %v120_v30 }
  0x88   :  { %v137_v41 = vmul.f32 %v217_v22, %v136_v35 }
  0x89   :  { %v122_v42 = vmul.f32 %v219_v24, %v121_v37 }
  0x8a   :  { %v72_v19 = vpop.f32.mrf.mxu0  ;;  %v138_v46 = vadd.f32 %v217_v22, %v137_v41 }
  0x8b   :  { %v73_v20 = vadd.f32 %v214_v18, %v72_v19  ;;  %v123_v51 = vadd.f32 %v219_v24, %v122_v42 }
  0x8c   :  { %v142_v55 = vsel %vm141_vm6, %v217_v22, %v138_v46 }
  0x8d   :  { %v78_v23 = vmax.f32 %v73_v20, 0.0  ;;  %v94_v32 = vpop.permute.xlu0 %93  ;;  %v127_v59 = vsel %vm126_vm7, %v219_v24, %v123_v51  ;;  %v147_v61 = vsel %vm144_vm8, %v146_v56, %v142_v55 }
  0x8e   :  { %v132_v63 = vsel %vm129_vm9, %v131_v60, %v127_v59 }
  0x8f   :  { %v95_v25 = vmul.f32 %v87_v21, %v78_v23 }
  0x90   :  { %v75_v26 = vpop.f32.mrf.mxu2 }
  0x91   :  { %v97_v28 = vsel %vm48_vm1, %v95_v25, 0.0  ;;  %v76_v29 = vadd.f32 %v214_v18, %v75_v26 }
  0x92   :  { %v98_v31 = vrot.slane %v97_v28, 4 }
  0x93   :  { %v79_v33 = vmax.f32 %v76_v29, 0.0 }
  0x94   :  { %v99_v34 = vadd.f32 %v98_v31, %v97_v28 }
  0x95   :  { %v96_v36 = vmul.f32 %v94_v32, %v79_v33 }
  0x96   :  { %v100_v38 = vrot.slane %v99_v34, 2 }
  0x97   :  { %v104_v39 = vsel %vm48_vm1, %v96_v36, 0.0 }
  0x98   :  { %v105_v40 = vrot.slane %v104_v39, 4  ;;  %v101_v43 = vadd.f32 %v100_v38, %v99_v34 }
  0x9a   :  { %v106_v44 = vadd.f32 %v105_v40, %v104_v39  ;;  %v102_v49 = vrot.slane %v101_v43, 1 }
  0x9c   :  { %v107_v45 = vrot.slane %v106_v44, 2  ;;  %v103_v57 = vadd.f32 %v102_v49, %v101_v43 }
  0x9e   :  { %v108_v50 = vadd.f32 %v107_v45, %v106_v44  ;;  %v133_v0 = vmul.f32 %v132_v63, %v103_v57 }
  0xa0   :  { %v109_v53 = vrot.slane %v108_v50, 1 }
  0xa2   :  { %v110_v58 = vadd.f32 %v109_v53, %v108_v50 }
  0xa4   :  { %v148_v62 = vmul.f32 %v147_v61, %v110_v58 }
  0xa6   :  { %v159_v1 = vrot.slane %v148_v62, 7 }
  0xa8   :  { %v161_v2 = vsel %vm160_vm10, %v159_v1, %v133_v0 }
  0xa9   :  { %205 = vmatmul.msk.f32.vlgmr.msra.gmra.mxu1 %vm48_vm1, %v161_v2 }
 0x126   :  { %v181_v4 = vpop.f32.mrf.mxu1 }
 0x127   :  { %v182_v5 = vadd.f32 %v215_v3, %v181_v4 }
 0x129   :  { %185 = vst.msk [vmem:[#allocation5] sm:$0x3] %vm184_vm11, %v182_v5 }
 0x12a   :  { %196 = dma.vmem_to_hbm [thread:$0]  %s192_s22, 32, %s194_s25, [#allocation4]  }
 0x12b   :  { %270 = dma.done.wait [#allocation4], 32  }
 0x12c   :  { %271 = vsyncadd [#allocation4], 4294967264 }
 0x12d   :  { %201 = vsyncpa [#allocation3], 1 }
 0x12e   :  { %202 = vsyncpa [#allocation4], 1 }

</bundles_post_ra>
